<compile_context>
chip_gen: v5e
topology: v5e:2x2
jax: 0.10.0
libtpu: 0.0.40
codegen_flags: <defaults>
</compile_context>

<pallas_src>
import functools
import math

import jax
import jax.numpy as jnp
from jax.experimental import pallas as pl
from jax.experimental.pallas import tpu as pltpu


# ----------------------------- tiling helpers ---------------------------------------


def _pick_tile(dim, align, cap):
    """Largest multiple of `align` that divides `dim` and is <= cap; else full extent."""
    if dim % align != 0:
        return dim
    t = min(cap, dim)
    t -= t % align
    while t >= align:
        if dim % t == 0:
            return t
        t -= align
    return dim


# ----------------------------- matmul kernel ----------------------------------------


def _matmul_kernel(x_ref, w_ref, *rest, activation, has_residual):
    if has_residual:
        r_ref, o_ref, acc_ref = rest
    else:
        o_ref, acc_ref = rest

    @pl.when(pl.program_id(2) == 0)
    def _():
        acc_ref[...] = jnp.zeros_like(acc_ref)

    acc_ref[...] += jnp.dot(
        x_ref[...], w_ref[...], preferred_element_type=jnp.float32
    )

    @pl.when(pl.program_id(2) == pl.num_programs(2) - 1)
    def _():
        acc = acc_ref[...]
        if activation == "gelu":
            acc = jax.nn.gelu(acc, approximate=True)
        if has_residual:
            acc = acc + r_ref[...].astype(jnp.float32)
        o_ref[...] = acc.astype(o_ref.dtype)


def pallas_matmul(x, w, *, residual=None, out_dtype=jnp.float32, activation=None):
    """y = act(x @ w) [+ residual].  bf16 MXU inputs, f32 accumulation, tiled M/N/K."""
    M, K = x.shape
    K2, N = w.shape
    assert K == K2
    xb = x.astype(jnp.bfloat16)
    wb = w.astype(jnp.bfloat16)

    tm = _pick_tile(M, 8, 256)
    tn = _pick_tile(N, 128, 512)
    tk = _pick_tile(K, 128, 512)
    grid = (M // tm, N // tn, K // tk)

    in_specs = [
        pl.BlockSpec((tm, tk), lambda i, j, k: (i, k)),
        pl.BlockSpec((tk, tn), lambda i, j, k: (k, j)),
    ]
    args = [xb, wb]
    if residual is not None:
        in_specs.append(pl.BlockSpec((tm, tn), lambda i, j, k: (i, j)))
        args.append(residual)

    kern = functools.partial(
        _matmul_kernel, activation=activation, has_residual=residual is not None
    )
    return pl.pallas_call(
        kern,
        out_shape=jax.ShapeDtypeStruct((M, N), out_dtype),
        grid=grid,
        in_specs=in_specs,
        out_specs=pl.BlockSpec((tm, tn), lambda i, j, k: (i, j)),
        scratch_shapes=[pltpu.VMEM((tm, tn), jnp.float32)],
        compiler_params=pltpu.CompilerParams(
            dimension_semantics=("parallel", "parallel", "arbitrary")
        ),
    )(*args)


# ----------------------------- attention kernel -------------------------------------


def _flash_attn_kernel(mask_ref, q_ref, k_ref, v_ref, o_ref,
                       m_sc, l_sc, acc_sc, *, sm_scale, tkv):
    kv = pl.program_id(1)

    @pl.when(kv == 0)
    def _():
        m_sc[...] = jnp.full_like(m_sc, -1e30)
        l_sc[...] = jnp.zeros_like(l_sc)
        acc_sc[...] = jnp.zeros_like(acc_sc)

    q = q_ref[0]          # (nh, S, dh) bf16
    k = k_ref[0]          # (nh, tkv, dh) bf16
    v = v_ref[0]
    S = q.shape[1]

    s = jnp.einsum("hqd,hkd->hqk", q, k,
                   preferred_element_type=jnp.float32) * sm_scale   # (nh, S, tkv)

    # in-kernel causal + padding mask (no O(S^2) HBM bias)
    q_idx = jax.lax.broadcasted_iota(jnp.int32, (S, tkv), 0)
    k_idx = jax.lax.broadcasted_iota(jnp.int32, (S, tkv), 1) + kv * tkv
    key_valid = mask_ref[0, :, :] > 0                                # (1, tkv)
    valid = (k_idx <= q_idx) & key_valid                             # (S, tkv)
    s = jnp.where(valid[None, :, :], s, -1e30)

    m_prev = m_sc[...]
    m_new = jnp.maximum(m_prev, jnp.max(s, axis=-1, keepdims=True))
    alpha = jnp.exp(m_prev - m_new)
    p = jnp.exp(s - m_new)
    l_sc[...] = alpha * l_sc[...] + jnp.sum(p, axis=-1, keepdims=True)
    acc_sc[...] = alpha * acc_sc[...] + jnp.einsum(
        "hqk,hkd->hqd", p.astype(v.dtype), v, preferred_element_type=jnp.float32
    )
    m_sc[...] = m_new

    @pl.when(kv == pl.num_programs(1) - 1)
    def _():
        o_ref[0] = (acc_sc[...] * pl.reciprocal(l_sc[...], approx=True)).astype(o_ref.dtype)


def pallas_attention(q, k, v, mask3d, sm_scale):
    """q,k,v: (B, nh, S, dh) bf16; mask3d: (B, 1, S) int32.  Returns (B, nh, S, dh) bf16."""
    B, nh, S, dh = q.shape
    tkv = _pick_tile(S, 128, 512)
    grid = (B, S // tkv)

    qspec = pl.BlockSpec((1, nh, S, dh), lambda b, kv: (b, 0, 0, 0))
    kvspec = pl.BlockSpec((1, nh, tkv, dh), lambda b, kv: (b, 0, kv, 0))
    kern = functools.partial(_flash_attn_kernel, sm_scale=sm_scale, tkv=tkv)
    # TODO(synk): for very long S, the full-length Q block / f32 accumulator should also
    # be tiled along the query axis.
    return pl.pallas_call(
        kern,
        out_shape=jax.ShapeDtypeStruct((B, nh, S, dh), jnp.bfloat16),
        grid=grid,
        in_specs=[
            pl.BlockSpec((1, 1, tkv), lambda b, kv: (b, 0, kv)),
            qspec, kvspec, kvspec,
        ],
        out_specs=qspec,
        scratch_shapes=[
            pltpu.VMEM((nh, S, 1), jnp.float32),
            pltpu.VMEM((nh, S, 1), jnp.float32),
            pltpu.VMEM((nh, S, dh), jnp.float32),
        ],
        compiler_params=pltpu.CompilerParams(
            dimension_semantics=("parallel", "arbitrary")
        ),
    )(mask3d, q, k, v)


# ----------------------------- adapter kernel ---------------------------------------


def _adapter_kernel(h_ref, a_ref, b_ref, cond_ref, scale_ref, o_ref):
    # out = h + scale * ( up(gelu(down(h))) + cond )
    h = h_ref[0]                                         # (ts, H) f32
    hb = h.astype(jnp.bfloat16)
    low = jnp.dot(hb, a_ref[...], preferred_element_type=jnp.float32)
    low = jax.nn.gelu(low, approximate=True)
    up = jnp.dot(low.astype(jnp.bfloat16), b_ref[...],
                 preferred_element_type=jnp.float32)
    adapted = up + cond_ref[0].astype(jnp.float32)       # (1, H) broadcasts over rows
    o_ref[0] = (h.astype(jnp.float32) + scale_ref[0] * adapted).astype(o_ref.dtype)


def pallas_adapter_residual(h, down_w, up_w, cond3, scale):
    """h: (B,S,H) f32; down_w:(H,r) bf16; up_w:(r,H) bf16; cond3:(B,1,H) f32; scale:(1,)."""
    B, S, H = h.shape
    r = down_w.shape[1]
    ts = _pick_tile(S, 8, 256)
    grid = (B, S // ts)
    return pl.pallas_call(
        _adapter_kernel,
        out_shape=jax.ShapeDtypeStruct((B, S, H), jnp.float32),
        grid=grid,
        in_specs=[
            pl.BlockSpec((1, ts, H), lambda b, s: (b, s, 0)),
            pl.BlockSpec((H, r), lambda b, s: (0, 0)),
            pl.BlockSpec((r, H), lambda b, s: (0, 0)),
            pl.BlockSpec((1, 1, H), lambda b, s: (b, 0, 0)),
            pl.BlockSpec(memory_space=pltpu.MemorySpace.SMEM),
        ],
        out_specs=pl.BlockSpec((1, ts, H), lambda b, s: (b, s, 0)),
        compiler_params=pltpu.CompilerParams(
            dimension_semantics=("parallel", "parallel")
        ),
    )(h, down_w, up_w, cond3, scale)


# ----------------------------- JAX glue (base model) --------------------------------


def rmsnorm(x, w):
    var = jnp.mean(x * x, axis=-1, keepdims=True)
    return x * jax.lax.rsqrt(var + 1e-6) * w


def decoder_layer(lp, x, mask3d, nh):
    B, S, H = x.shape
    dh = H // nh
    x2 = x.reshape(B * S, H)

    # --- self-attention block (fused QKV, fused wo + residual) ---
    h2 = rmsnorm(x, lp["ln1"]).reshape(B * S, H)
    qkv = pallas_matmul(h2, lp["wqkv"], out_dtype=jnp.bfloat16)        # (B*S, 3H)
    # TODO(synk): this head-layout transpose is done by XLA; it could be folded into the
    # QKV out_spec index_map to save an HBM pass.
    qkv = qkv.reshape(B, S, 3, nh, dh).transpose(2, 0, 3, 1, 4)        # (3, B, nh, S, dh)
    attn = pallas_attention(qkv[0], qkv[1], qkv[2], mask3d, 1.0 / math.sqrt(dh))
    attn2 = attn.transpose(0, 2, 1, 3).reshape(B * S, H)
    x = pallas_matmul(attn2, lp["wo"], residual=x2,
                      out_dtype=jnp.float32).reshape(B, S, H)

    # --- MLP block (fused gelu, fused residual) ---
    x2 = x.reshape(B * S, H)
    h2 = rmsnorm(x, lp["ln2"]).reshape(B * S, H)
    m = pallas_matmul(h2, lp["w1"], out_dtype=jnp.bfloat16, activation="gelu")
    x = pallas_matmul(m, lp["w2"], residual=x2,
                      out_dtype=jnp.float32).reshape(B, S, H)
    return x


def base_model_forward(params, input_ids, attention_mask, nh):
    # TODO(synk): embedding gather stays in plain JAX (no clean dense-Pallas equivalent).
    x = params["embed"][input_ids]
    B, S = input_ids.shape
    mask3d = attention_mask.astype(jnp.int32).reshape(B, 1, S)
    hidden_states = [x]
    for lp in params["layers"]:
        x = decoder_layer(lp, x, mask3d, nh)
        hidden_states.append(x)
    return hidden_states


# ----------------------------- DynamoModel forward ----------------------------------


def dynamo_forward(params, cfg, input_ids, attention_mask, time_input, causal_input,
                   labels=None):
    B, S = input_ids.shape
    H, V = cfg["hidden"], cfg["vocab"]
    hidden_states = base_model_forward(params, input_ids, attention_mask, cfg["heads"])

    scale = params["scale"]                               # (1,), like nn.Parameter(ones(1))
    tc_input = jnp.concatenate([time_input, causal_input], axis=-1)    # (B, T+C)

    new_hidden_states = [hidden_states[0]]
    for i, ap in enumerate(params["adapters"]):
        layer_output = hidden_states[i + 1]               # (B, S, H) f32
        # conditioning = time_proj(time_input) + causal_proj(causal_input)   (B, H)
        w_cat = jnp.concatenate([ap["time_w"], ap["causal_w"]], axis=0)
        cond = pallas_matmul(tc_input, w_cat) + ap["time_b"] + ap["causal_b"]
        cond3 = cond[:, None, :]                          # (B, 1, H) — no (B*S,H) broadcast

        # LoRA rank padded to 128 lanes (exact: padded columns give gelu(0)=0 against
        # zero-padded rows of `up`).
        r = ap["down"].shape[1]
        r_pad = max(128, ((r + 127) // 128) * 128)
        down = jnp.zeros((H, r_pad), jnp.bfloat16).at[:, :r].set(
            ap["down"].astype(jnp.bfloat16))
        up = jnp.zeros((r_pad, H), jnp.bfloat16).at[:r, :].set(
            ap["up"].astype(jnp.bfloat16))

        new_hidden_states.append(
            pallas_adapter_residual(layer_output, down, up, cond3, scale)
        )

    last_hidden_state = new_hidden_states[-1]
    logits = pallas_matmul(
        last_hidden_state.reshape(B * S, H), params["lm_head"], out_dtype=jnp.float32
    ).reshape(B, S, V)

    loss = None
    if labels is not None:
        # shifted cross-entropy (plain JAX glue)
        shift_logits = logits[:, :-1, :].reshape(-1, V)
        shift_labels = labels[:, 1:].reshape(-1)
        logp = jax.nn.log_softmax(shift_logits, axis=-1)
        loss = -jnp.mean(jnp.take_along_axis(logp, shift_labels[:, None], axis=-1))

    return {"loss": loss, "logits": logits, "hidden_states": tuple(new_hidden_states)}


# ----------------------------- deterministic init -----------------------------------


def init_params(cfg):
    key = jax.random.PRNGKey(0)

    def nxt():
        nonlocal key
        key, sub = jax.random.split(key)
        return sub

    std = 0.02
    H, V, I = cfg["hidden"], cfg["vocab"], cfg["intermediate"]
    T, C, r, L = cfg["time_dim"], cfg["causal_dim"], cfg["rank"], cfg["layers"]

    params = {
        "embed": jax.random.normal(nxt(), (V, H), jnp.float32) * std,
        "lm_head": jax.random.normal(nxt(), (H, V), jnp.float32) * std,
        "scale": jnp.ones((1,), jnp.float32),
        "layers": [],
        "adapters": [],
    }
    for _ in range(L):
        wq = jax.random.normal(nxt(), (H, H), jnp.float32) * std
        wk = jax.random.normal(nxt(), (H, H), jnp.float32) * std
        wv = jax.random.normal(nxt(), (H, H), jnp.float32) * std
        params["layers"].append({
            "ln1": jnp.ones((H,), jnp.float32),
            "wqkv": jnp.concatenate([wq, wk, wv], axis=1),   # fused QKV weight (H, 3H)
            "wo": jax.random.normal(nxt(), (H, H), jnp.float32) * std,
            "ln2": jnp.ones((H,), jnp.float32),
            "w1": jax.random.normal(nxt(), (H, I), jnp.float32) * std,
            "w2": jax.random.normal(nxt(), (I, H), jnp.float32) * std,
        })
        params["adapters"].append({
            "time_w": jax.random.normal(nxt(), (T, H), jnp.float32) * std,
            "time_b": jnp.zeros((H,), jnp.float32),
            "causal_w": jax.random.normal(nxt(), (C, H), jnp.float32) * std,
            "causal_b": jnp.zeros((H,), jnp.float32),
            "down": jax.random.normal(nxt(), (H, r), jnp.float32) * std,
            "up": jax.random.normal(nxt(), (r, H), jnp.float32) * std,
        })
    return params


# ----------------------------- main --------------------------------------------------

if __name__ == "__main__":
    cfg = dict(hidden=32, heads=4, intermediate=64, vocab=64, layers=2,
               time_dim=16, causal_dim=16, rank=8)
    params = init_params(cfg)

    key = jax.random.PRNGKey(0)
    k1, k2, k3 = jax.random.split(key, 3)
    B, S = 2, 8
    input_ids = jax.random.randint(k1, (B, S), 0, cfg["vocab"], dtype=jnp.int32)
    attention_mask = jnp.ones((B, S), dtype=jnp.int32)
    time_input = jax.random.normal(k2, (B, cfg["time_dim"]), jnp.float32)
    causal_input = jax.random.normal(k3, (B, cfg["causal_dim"]), jnp.float32)

    out = dynamo_forward(params, cfg, input_ids, attention_mask, time_input, causal_input)
    logits = jax.block_until_ready(out["logits"])

    assert logits.shape == (B, S, cfg["vocab"])
    assert len(out["hidden_states"]) == cfg["layers"] + 1
    assert bool(jnp.all(jnp.isfinite(logits)))
    print("KERNEL_OK")
</pallas_src>

<mosaic_0001>
module attributes {stable_mosaic.version = 11 : i64} {
  func.func @_matmul_kernel(%arg0: i32, %arg1: i32, %arg2: i32, %arg3: memref<16x32xbf16, #tpu.memory_space<vmem>>, %arg4: memref<32x96xbf16, #tpu.memory_space<vmem>>, %arg5: memref<16x96xbf16, #tpu.memory_space<vmem>>, %arg6: memref<16x96xf32, #tpu.memory_space<vmem>>) attributes {dimension_semantics = [#tpu.dimension_semantics<parallel>, #tpu.dimension_semantics<parallel>, #tpu.dimension_semantics<arbitrary>], iteration_bounds = array<i64: 1, 1, 1>, scalar_prefetch = 0 : i64, scratch_operands = 1 : i64, tpu.core_type = #tpu.core_type<tc>, window_params = [{transform_indices = @transform_0, window_bounds = array<i64: 16, 32>}, {transform_indices = @transform_1, window_bounds = array<i64: 32, 96>}, {transform_indices = @transform_2, window_bounds = array<i64: 16, 96>}]} {
    %c0_i32 = arith.constant 0 : i32
    %0 = arith.cmpi eq, %arg2, %c0_i32 : i32
    %1 = arith.extui %0 : i1 to i32
    %c0_i32_0 = arith.constant 0 : i32
    %2 = arith.cmpi ne, %1, %c0_i32_0 : i32
    scf.if %2 {
      %cst_10 = arith.constant 0.000000e+00 : f32
      %12 = vector.broadcast %cst_10 : f32 to vector<16x96xf32>
      %c0_11 = arith.constant 0 : index
      %c0_12 = arith.constant 0 : index
      %13 = vector.load %arg6[%c0_11, %c0_12] : memref<16x96xf32, #tpu.memory_space<vmem>>, vector<16x96xf32>
      tpu.vector_store %arg6[%c0_11, %c0_12], %12 {strides = array<i32>} : memref<16x96xf32, #tpu.memory_space<vmem>>, vector<16x96xf32>,
    } else {
    }
    %c0 = arith.constant 0 : index
    %c0_1 = arith.constant 0 : index
    %3 = vector.load %arg6[%c0, %c0_1] : memref<16x96xf32, #tpu.memory_space<vmem>>, vector<16x96xf32>
    %c0_2 = arith.constant 0 : index
    %c0_3 = arith.constant 0 : index
    %4 = vector.load %arg3[%c0_2, %c0_3] : memref<16x32xbf16, #tpu.memory_space<vmem>>, vector<16x32xbf16>
    %c0_4 = arith.constant 0 : index
    %c0_5 = arith.constant 0 : index
    %5 = vector.load %arg4[%c0_4, %c0_5] : memref<32x96xbf16, #tpu.memory_space<vmem>>, vector<32x96xbf16>
    %cst = arith.constant dense<0.000000e+00> : vector<16x96xf32>
    %6 = tpu.matmul %4, %5, %cst {dimension_numbers = #tpu.dot_dimension_numbers<[1], [0], [0], [1], [0, 0, 1, 1], [], []>} : vector<16x32xbf16>, vector<32x96xbf16>, vector<16x96xf32> -> vector<16x96xf32>
    %7 = arith.addf %3, %6 : vector<16x96xf32>
    %c0_6 = arith.constant 0 : index
    %c0_7 = arith.constant 0 : index
    %8 = vector.load %arg6[%c0_6, %c0_7] : memref<16x96xf32, #tpu.memory_space<vmem>>, vector<16x96xf32>
    tpu.vector_store %arg6[%c0_6, %c0_7], %7 {strides = array<i32>} : memref<16x96xf32, #tpu.memory_space<vmem>>, vector<16x96xf32>,
    %c0_i32_8 = arith.constant 0 : i32
    %9 = arith.cmpi eq, %arg2, %c0_i32_8 : i32
    %10 = arith.extui %9 : i1 to i32
    %c0_i32_9 = arith.constant 0 : i32
    %11 = arith.cmpi ne, %10, %c0_i32_9 : i32
    scf.if %11 {
      %c0_10 = arith.constant 0 : index
      %c0_11 = arith.constant 0 : index
      %12 = vector.load %arg6[%c0_10, %c0_11] : memref<16x96xf32, #tpu.memory_space<vmem>>, vector<16x96xf32>
      %13 = arith.truncf %12 : vector<16x96xf32> to vector<16x96xbf16>
      %c0_12 = arith.constant 0 : index
      %c0_13 = arith.constant 0 : index
      %14 = vector.load %arg5[%c0_12, %c0_13] : memref<16x96xbf16, #tpu.memory_space<vmem>>, vector<16x96xbf16>
      tpu.vector_store %arg5[%c0_12, %c0_13], %13 {strides = array<i32>} : memref<16x96xbf16, #tpu.memory_space<vmem>>, vector<16x96xbf16>,
    } else {
    }
    return
  }
  func.func @transform_0(%arg0: i32, %arg1: i32, %arg2: i32) -> (i32, i32) {
    %c0_i32 = arith.constant 0 : i32
    return %arg0, %arg2 : i32, i32
  }
  func.func @transform_1(%arg0: i32, %arg1: i32, %arg2: i32) -> (i32, i32) {
    %c0_i32 = arith.constant 0 : i32
    return %arg2, %arg1 : i32, i32
  }
  func.func @transform_2(%arg0: i32, %arg1: i32, %arg2: i32) -> (i32, i32) {
    %c0_i32 = arith.constant 0 : i32
    return %arg0, %arg1 : i32, i32
  }
}

</mosaic_0001>

<bundles_post_ra>
// kernel: tpu_custom_call.1
= control target key start
LH: loop header
LB: loop body
LE: loop exit
PB: predicated region body
PF: predicated region fallthrough
CT: control target
= control target key end

     0   :  { %7 = vsyncpa [#allocation4], 0  ;;  %s273_s0 = inlined_call_operand.hbm [shape: bf16[16,32], index: 0, kind: input, shape index: {}]   ;;  %s274_s1 = inlined_call_operand.hbm [shape: bf16[32,96], index: 1, kind: input, shape index: {}]   ;;  %s275_s2 = inlined_call_operand.hbm [shape: bf16[16,96], index: 2, kind: output, shape index: {}]  }
   0x1   :  { %8 = vsyncpa [#allocation7], 0 }
   0x2   :  { %9 = vsyncpa [#allocation5], 0  ;;  %s14_s11 = sshll.u32 %s273_s0, 4  ;;  %s230_s12 = smov [#allocation3]   ;;  %s15_s11 = int_to_ptr.hbm [resolvable:$true] %s14_s11 }
   0x3   :  { %s16_s13 = sshll.u32 %s230_s12, 4  ;;  %s27_s16 = sshll.u32 %s274_s1, 4  ;;  %s17_s13 = int_to_ptr.vmem [resolvable:$true] %s16_s13  ;;  %s28_s16 = int_to_ptr.hbm [resolvable:$true] %s27_s16 }
   0x4   :  { %s231_s17 = smov 64   ;;  %s232_s18 = smov 4  }
   0x5   :  { %22 = dma.hbm_to_vmem [thread:$0]  %s15_s11, 128, %s17_s13, [#allocation4], %s231_s17, %s231_s17, %s232_s18  }
   0x6   :  { %s233_s19 = smov [#allocation6]  }
   0x7   :  { %s29_s20 = sshll.u32 %s233_s19, 4  ;;  %s30_s20 = int_to_ptr.vmem [resolvable:$true] %s29_s20 }
   0x8   :  { %35 = dma.hbm_to_vmem [thread:$0]  %s28_s16, 256, %s30_s20, [#allocation7], %s231_s17, %s231_s17, %s232_s18  }
   0x9   :  { %224 = dma.done.wait [#allocation4], 128  }
   0xa   :  { %225 = vsyncadd [#allocation4], 4294967168 }
   0xb   :  { %226 = dma.done.wait [#allocation7], 256  }
   0xc   :  { %227 = vsyncadd [#allocation7], 4294967040  ;;  %vm49_vm0 = vcmask 785408   ;;  %v234_v0 = vmov 0.0   ;;  %v145_v1 = vld [vmem:[#allocation6 + $0x8] sm:$0xff]  ;;  %v144_v2 = vld [vmem:[#allocation6] sm:$0xff] }
   0xd   :  { %50 = vst.msk [vmem:[#allocation2] sm:$0xff] %vm49_vm0, %v234_v0  ;;  %87 = vmatpush.bf16.msra.mxu0 %v145_v1  ;;  %v143_v3 = vld [vmem:[#allocation3] sm:$0xff]  ;;  %vm77_vm1 = vcmask 261120   ;;  %vm107_vm2 = vcmask 781312   ;;  %s235_s0 = smov [#allocation8]   ;;  %s116_s23 = sshll.u32 %s275_s2, 4  ;;  %s117_s23 = int_to_ptr.hbm [resolvable:$true] %s116_s23 }
   0xe   :  { %51 = vst.msk [vmem:[#allocation2 + $0x8] sm:$0xff] %vm49_vm0, %v234_v0  ;;  %s114_s1 = sshll.u32 %s235_s0, 4  ;;  %s115_s1 = int_to_ptr.vmem [resolvable:$true] %s114_s1 }
  0x11   :  { %88 = vmatpush.bf16.msra.mxu0 %v144_v2 }
  0x14   :  { %142 = vmatmul.msk.bf16.vlgmr.msra.gmra.mxu0 %vm77_vm1, %v143_v3  ;;  %v52_v4 = vld [vmem:[#allocation2] sm:$0xff] }
  0x15   :  { %v53_v7 = vld [vmem:[#allocation2 + $0x8] sm:$0xff] }
  0x91   :  { %v90_v5 = vpop.f32.mrf.mxu0 }
  0x92   :  { %v95_v6 = vadd.f32 %v90_v5, %v52_v4 }
  0x94   :  { %98 = vst.msk [vmem:[#allocation2] sm:$0xff] %vm49_vm0, %v95_v6 }
  0x99   :  { %v92_v8 = vpop.f32.mrf.mxu0 }
  0x9a   :  { %v96_v9 = vadd.f32 %v92_v8, %v53_v7 }
  0x9b   :  { %v103_v10 = vld [vmem:[#allocation2] sm:$0xff] }
  0x9c   :  { %99 = vst.msk [vmem:[#allocation2 + $0x8] sm:$0xff] %vm49_vm0, %v96_v9  ;;  %v105_v11 = vpack.c.bf16 %v103_v10, %v103_v10 }
  0x9e   :  { %108 = vst.msk [vmem:[#allocation8] sm:$0xf] %vm107_vm2, %v105_v11 }
  0xa3   :  { %v104_v12 = vld [vmem:[#allocation2 + $0x8] sm:$0xff] }
  0xa4   :  { %v106_v13 = vpack.c.bf16 %v104_v12, %v104_v12 }
  0xa6   :  { %109 = vst.msk [vmem:[#allocation8 + $0x4] sm:$0xf] %vm107_vm2, %v106_v13 }
  0xa7   :  { %122 = dma.vmem_to_hbm [thread:$0]  %s115_s1, 128, %s117_s23, [#allocation5], %s231_s17, %s231_s17, %s232_s18  }
  0xa8   :  { %228 = dma.done.wait [#allocation5], 128  }
  0xa9   :  { %229 = vsyncadd [#allocation5], 4294967168 }
  0xaa   :  { %127 = vsyncpa [#allocation4], 1 }
  0xab   :  { %128 = vsyncpa [#allocation7], 1 }
  0xac   :  { %129 = vsyncpa [#allocation5], 1 }

</bundles_post_ra>
